<compile_context>
chip_gen: v5e
topology: v5e:2x2
jax: 0.10.0
libtpu: 0.0.40
codegen_flags: <defaults>
</compile_context>

<pallas_src>
import jax
import jax.numpy as jnp
from jax.experimental import pallas as pl
from jax.experimental.pallas import tpu as pltpu

NEG_SLOPE = 0.01       # nn.LeakyReLU default negative_slope
BN_EPS = 1e-5          # nn.BatchNorm1d default eps
TILE_F = 512           # pairs per grid step (auto-shrunk for small F)
LANE = 128             # TPU lane width
BG_PAD = 128           # bg classifier padded to a full lane group for the MXU


def _round_up(x, m):
    return (x + m - 1) // m * m


def _leaky(h):
    return jnp.where(h > 0, h, NEG_SLOPE * h)


def _pick_tile_f(num_pairs, requested):
    """Multiple of 128 (lane-dense transposed output store); keep >=2 tiles when
    there is enough work so the "parallel" grid axis feeds both v7x TensorCores."""
    tf = _round_up(max(requested, LANE), LANE)
    if num_pairs > LANE:
        tf = min(tf, _round_up(-(-num_pairs // 2), LANE))
    else:
        tf = LANE
    return tf


def _relation_kernel(
        # activations (tiled over F)
        zv_ref, zw_ref, iou_ref,
        # visual PairNet residual weights (BN folded, pre-transposed)
        v_w1i_ref, v_b1_ref, v_w2_ref, v_b2_ref, v_wbg_ref,
        # word2vec PairNet residual weights
        w_w1i_ref, w_b1_ref, w_w2_ref, w_b2_ref, w_wbg_ref,
        # shared bg bias (includes BN2 shift contributions)
        bbg_ref,
        out_ref):
    iou = iou_ref[...]                                        # (tile_f, 1) f32

    def branch(z_ref, w_iou_ref, b1_ref, w2_ref, b2_ref, wbg_ref_):
        # Linear1: per-object subject/object projections were precomputed and
        # gathered in the wrapper (z); only the rank-1 IoU row + bias remain.
        h = z_ref[...].astype(jnp.float32) + iou * w_iou_ref[...] + b1_ref[...]
        h = _leaky(h)
        # BN1 folded into w2/b2; Dropout(eval)=identity
        h = jnp.dot(h.astype(jnp.bfloat16), w2_ref[...],
                    preferred_element_type=jnp.float32) + b2_ref[...]
        h = _leaky(h)
        # BN2 folded into the (128-padded) bg projection
        return jnp.dot(h.astype(jnp.bfloat16), wbg_ref_[...],
                       preferred_element_type=jnp.float32)

    bg = branch(zv_ref, v_w1i_ref, v_b1_ref, v_w2_ref, v_b2_ref, v_wbg_ref)
    bg = bg + branch(zw_ref, w_w1i_ref, w_b1_ref, w_w2_ref, w_b2_ref, w_wbg_ref)
    bg = bg + bbg_ref[...]                                    # (tile_f, 128) f32
    # Lane-major store: only column 0 is the logit; the transpose rides the
    # otherwise-idle XLU while the kernel is MXU-bound.
    out_ref[...] = jnp.transpose(bg)[0:1, :]                  # (1, tile_f)


def relation_net_forward(feats, w2v, pairs, ious, params, *, tile_f=TILE_F):
    """feats:(O,Dv) w2v:(O,Dw) pairs:(F,2) ious:(F,1) -> (F,1) bg logits (eval)."""
    pairs = pairs.astype(jnp.int32)
    num_pairs = pairs.shape[0]

    kernel_weights = params["kernel"]
    h_pad = kernel_weights[2].shape[0]        # v_w2 rows == padded hidden dim

    tile_f = _pick_tile_f(num_pairs, tile_f)
    f_pad = _round_up(max(num_pairs, 1), tile_f)
    num_tiles = f_pad // tile_f

    # ---- per-object Linear1 precompute (plain XLA), O(O·D·H) instead of O(F·D·H)
    def project(table, proj):
        w_s, w_o = proj                                       # bf16 (D, H_pad)
        t16 = table.astype(jnp.bfloat16)
        ps = jnp.dot(t16, w_s, preferred_element_type=jnp.float32)
        po = jnp.dot(t16, w_o, preferred_element_type=jnp.float32)
        return ps, po

    pv_s, pv_o = project(feats, params["v_proj"])
    pw_s, pw_o = project(w2v, params["w_proj"])

    subj, obj = pairs[:, 0], pairs[:, 1]

    def gather_sum(ps, po):
        z = (ps[subj] + po[obj]).astype(jnp.bfloat16)         # (F, H_pad)
        return jnp.pad(z, ((0, f_pad - num_pairs), (0, 0)))

    zv = gather_sum(pv_s, pv_o)
    zw = gather_sum(pw_s, pw_o)
    iou = jnp.pad(ious.astype(jnp.float32), ((0, f_pad - num_pairs), (0, 0)))

    # ---- BlockSpecs
    def act_spec(d):                       # tiled over F, default double-buffered
        return pl.BlockSpec((tile_f, d), lambda i: (i, 0))

    def resident(p):                       # constant index -> stays in VMEM,
        return pl.BlockSpec(p.shape, lambda i: (0, 0),        # single-buffered
                            pipeline_mode=pl.Buffered(1))

    in_specs = ([act_spec(h_pad), act_spec(h_pad), act_spec(1)]
                + [resident(p) for p in kernel_weights])
    out_spec = pl.BlockSpec((1, tile_f), lambda i: (0, i))

    # ---- VMEM budget: single-buffered weights + double-buffered activation tiles
    # + headroom; stays well under v7x's 64 MiB/TC.
    weight_bytes = sum(int(p.size) * p.dtype.itemsize for p in kernel_weights)
    act_bytes = tile_f * (2 * h_pad * 2 + 4) + tile_f * 4     # zv+zw bf16, iou, out
    vmem_limit = int(min(60 << 20,
                         max(32 << 20, weight_bytes + 4 * act_bytes + (16 << 20))))

    out = pl.pallas_call(
        _relation_kernel,
        out_shape=jax.ShapeDtypeStruct((1, f_pad), jnp.float32),
        grid=(num_tiles,),
        in_specs=in_specs,
        out_specs=out_spec,
        compiler_params=pltpu.CompilerParams(
            dimension_semantics=("parallel",),     # megacore sharding on v7x
            vmem_limit_bytes=vmem_limit),
    )(zv, zw, iou, *kernel_weights)

    return out[0, :num_pairs][:, None]


# ---------------------------------------------------------------------------
# Parameter construction (mirrors the PyTorch module) and offline folding.
# ---------------------------------------------------------------------------

def init_params(key, feature_dim, w2v_dim, hidden_dim):
    """Raw params in PyTorch layout: Linear W:(out,in) kaiming_normal_, default bias;
    fresh BatchNorm1d (gamma=1, beta=0, running_mean=0, running_var=1)."""
    def linear(k, fan_in, fan_out):
        kw, kb = jax.random.split(k)
        std = (2.0 / fan_in) ** 0.5
        w = std * jax.random.normal(kw, (fan_out, fan_in), jnp.float32)
        bound = 1.0 / (fan_in ** 0.5)
        b = jax.random.uniform(kb, (fan_out,), jnp.float32, -bound, bound)
        return w, b

    def bn(h):
        return (jnp.ones((h,), jnp.float32), jnp.zeros((h,), jnp.float32),
                jnp.zeros((h,), jnp.float32), jnp.ones((h,), jnp.float32))

    def pairnet_params(k, in_dim):
        k1, k2 = jax.random.split(k)
        w1, b1 = linear(k1, in_dim, hidden_dim)
        w2, b2 = linear(k2, hidden_dim, hidden_dim)
        return (w1, b1) + bn(hidden_dim) + (w2, b2) + bn(hidden_dim)

    kv, kw, kbg = jax.random.split(key, 3)
    return {
        "v": pairnet_params(kv, 2 * feature_dim + 1),
        "w": pairnet_params(kw, 2 * w2v_dim + 1),
        "bg_w": linear(kbg, hidden_dim, 1)[0],
        "bg_b": linear(kbg, hidden_dim, 1)[1],
    }


def prepare_kernel_params(raw, feature_dim, w2v_dim):
    """Pre-transpose, split Linear1 into subject/object/IoU parts, fold eval-mode
    BN into the following Linear, zero-pad hidden to a lane multiple, cast matmul
    weights to bf16."""
    hidden = raw["bg_w"].shape[1]
    h_pad = _round_up(hidden, LANE)
    wbg_t = raw["bg_w"].T                                     # (H, 1)

    def fold_branch(p, d_in):
        w1, b1, g1, be1, m1, v1, w2, b2, g2, be2, m2, v2 = p
        w1t = w1.T                                            # (2*D+1, H)
        pad_h = ((0, 0), (0, h_pad - hidden))
        w_s = jnp.pad(w1t[:d_in], pad_h).astype(jnp.bfloat16)            # (D, H_pad)
        w_o = jnp.pad(w1t[d_in:2 * d_in], pad_h).astype(jnp.bfloat16)    # (D, H_pad)
        w_iou = jnp.pad(w1t[2 * d_in:2 * d_in + 1], pad_h)               # (1, H_pad)
        b1p = jnp.pad(b1[None, :], pad_h)
        s1 = g1 / jnp.sqrt(v1 + BN_EPS)
        t1 = be1 - m1 * s1
        s2 = g2 / jnp.sqrt(v2 + BN_EPS)
        t2 = be2 - m2 * s2
        w2t = w2.T                                            # (H, H)
        w2_eff = jnp.pad(s1[:, None] * w2t,                   # BN1 folded in
                         ((0, h_pad - hidden), (0, h_pad - hidden)))
        b2_eff = jnp.pad((b2 + t1 @ w2t)[None, :], pad_h)
        wbg_eff = jnp.pad(s2[:, None] * wbg_t,                # BN2 folded in
                          ((0, h_pad - hidden), (0, BG_PAD - 1)))
        bbg_contrib = t2 @ wbg_t                              # (1,)
        proj = (w_s, w_o)
        kern = (w_iou.astype(jnp.float32), b1p.astype(jnp.float32),
                w2_eff.astype(jnp.bfloat16), b2_eff.astype(jnp.float32),
                wbg_eff.astype(jnp.bfloat16))
        return proj, kern, bbg_contrib

    v_proj, v_kern, v_bg = fold_branch(raw["v"], feature_dim)
    w_proj, w_kern, w_bg = fold_branch(raw["w"], w2v_dim)
    bbg = (raw["bg_b"] + v_bg + w_bg).reshape(1, 1)
    bbg = jnp.broadcast_to(bbg, (1, BG_PAD)).astype(jnp.float32)
    return {"v_proj": v_proj, "w_proj": w_proj,
            "kernel": v_kern + w_kern + (bbg,)}


def relation_net_reference(feats, w2v, pairs, ious, raw):
    """Pure-JAX f32 reference of the PyTorch module in eval mode."""
    def pairnet(x, p):
        w1, b1, g1, be1, m1, v1, w2, b2, g2, be2, m2, v2 = p
        h = x @ w1.T + b1
        h = jnp.where(h > 0, h, NEG_SLOPE * h)
        h = (h - m1) / jnp.sqrt(v1 + BN_EPS) * g1 + be1
        h = h @ w2.T + b2
        h = jnp.where(h > 0, h, NEG_SLOPE * h)
        h = (h - m2) / jnp.sqrt(v2 + BN_EPS) * g2 + be2
        return h

    pairs = pairs.astype(jnp.int32)
    xv = jnp.concatenate([feats[pairs[:, 0]], feats[pairs[:, 1]], ious], -1)
    xw = jnp.concatenate([w2v[pairs[:, 0]], w2v[pairs[:, 1]], ious], -1)
    feat = pairnet(xv, raw["v"]) + pairnet(xw, raw["w"])
    return feat @ raw["bg_w"].T + raw["bg_b"]


if __name__ == "__main__":
    key = jax.random.PRNGKey(0)
    num_objects = 16
    num_pairs = 24
    feature_dim = 32   # small stand-in for 2048
    w2v_dim = 16       # small stand-in for 300
    hidden_dim = 32    # small stand-in for 1024

    k1, k2, k3, k4, kp = jax.random.split(key, 5)
    feats = jax.random.normal(k1, (num_objects, feature_dim), jnp.float32)
    w2v = jax.random.normal(k2, (num_objects, w2v_dim), jnp.float32)
    pairs = jax.random.randint(k3, (num_pairs, 2), 0, num_objects, jnp.int32)
    ious = jax.random.uniform(k4, (num_pairs, 1), jnp.float32)

    raw = init_params(kp, feature_dim, w2v_dim, hidden_dim)
    params = prepare_kernel_params(raw, feature_dim, w2v_dim)

    out = relation_net_forward(feats, w2v, pairs, ious, params)
    out = jax.block_until_ready(out)
    assert out.shape == (num_pairs, 1)
    assert out.dtype == jnp.float32

    ref = relation_net_reference(feats, w2v, pairs, ious, raw)
    assert jnp.allclose(out, ref, rtol=5e-2, atol=5e-2), (out, ref)
    print("KERNEL_OK")
</pallas_src>

<mosaic_0001>
module attributes {stable_mosaic.version = 11 : i64} {
  func.func @_relation_kernel(%arg0: i32, %arg1: memref<128x128xbf16, #tpu.memory_space<vmem>>, %arg2: memref<128x128xbf16, #tpu.memory_space<vmem>>, %arg3: memref<128x1xf32, #tpu.memory_space<vmem>>, %arg4: memref<1x128xf32, #tpu.memory_space<vmem>>, %arg5: memref<1x128xf32, #tpu.memory_space<vmem>>, %arg6: memref<128x128xbf16, #tpu.memory_space<vmem>>, %arg7: memref<1x128xf32, #tpu.memory_space<vmem>>, %arg8: memref<128x128xbf16, #tpu.memory_space<vmem>>, %arg9: memref<1x128xf32, #tpu.memory_space<vmem>>, %arg10: memref<1x128xf32, #tpu.memory_space<vmem>>, %arg11: memref<128x128xbf16, #tpu.memory_space<vmem>>, %arg12: memref<1x128xf32, #tpu.memory_space<vmem>>, %arg13: memref<128x128xbf16, #tpu.memory_space<vmem>>, %arg14: memref<1x128xf32, #tpu.memory_space<vmem>>, %arg15: memref<1x128xf32, #tpu.memory_space<vmem>>) attributes {dimension_semantics = [#tpu.dimension_semantics<parallel>], iteration_bounds = array<i64: 1>, scalar_prefetch = 0 : i64, scratch_operands = 0 : i64, tpu.core_type = #tpu.core_type<tc>, window_params = [{transform_indices = @transform_0, window_bounds = array<i64: 128, 128>}, {transform_indices = @transform_1, window_bounds = array<i64: 128, 128>}, {transform_indices = @transform_2, window_bounds = array<i64: 128, 1>}, {pipeline_mode = #tpu.pipeline_mode<synchronous>, transform_indices = @transform_3, window_bounds = array<i64: 1, 128>}, {pipeline_mode = #tpu.pipeline_mode<synchronous>, transform_indices = @transform_4, window_bounds = array<i64: 1, 128>}, {pipeline_mode = #tpu.pipeline_mode<synchronous>, transform_indices = @transform_5, window_bounds = array<i64: 128, 128>}, {pipeline_mode = #tpu.pipeline_mode<synchronous>, transform_indices = @transform_6, window_bounds = array<i64: 1, 128>}, {pipeline_mode = #tpu.pipeline_mode<synchronous>, transform_indices = @transform_7, window_bounds = array<i64: 128, 128>}, {pipeline_mode = #tpu.pipeline_mode<synchronous>, transform_indices = @transform_8, window_bounds = array<i64: 1, 128>}, {pipeline_mode = #tpu.pipeline_mode<synchronous>, transform_indices = @transform_9, window_bounds = array<i64: 1, 128>}, {pipeline_mode = #tpu.pipeline_mode<synchronous>, transform_indices = @transform_10, window_bounds = array<i64: 128, 128>}, {pipeline_mode = #tpu.pipeline_mode<synchronous>, transform_indices = @transform_11, window_bounds = array<i64: 1, 128>}, {pipeline_mode = #tpu.pipeline_mode<synchronous>, transform_indices = @transform_12, window_bounds = array<i64: 128, 128>}, {pipeline_mode = #tpu.pipeline_mode<synchronous>, transform_indices = @transform_13, window_bounds = array<i64: 1, 128>}, {transform_indices = @transform_14, window_bounds = array<i64: 1, 128>}]} {
    %c0 = arith.constant 0 : index
    %c0_0 = arith.constant 0 : index
    %0 = vector.load %arg3[%c0, %c0_0] : memref<128x1xf32, #tpu.memory_space<vmem>>, vector<128x1xf32>
    %c0_1 = arith.constant 0 : index
    %c0_2 = arith.constant 0 : index
    %1 = vector.load %arg1[%c0_1, %c0_2] : memref<128x128xbf16, #tpu.memory_space<vmem>>, vector<128x128xbf16>
    %2 = arith.extf %1 : vector<128x128xbf16> to vector<128x128xf32>
    %c0_3 = arith.constant 0 : index
    %c0_4 = arith.constant 0 : index
    %3 = vector.load %arg4[%c0_3, %c0_4] : memref<1x128xf32, #tpu.memory_space<vmem>>, vector<1x128xf32>
    %4 = vector.broadcast %0 : vector<128x1xf32> to vector<128x128xf32>
    %5 = vector.broadcast %3 : vector<1x128xf32> to vector<128x128xf32>
    %6 = arith.mulf %4, %5 : vector<128x128xf32>
    %7 = arith.addf %2, %6 : vector<128x128xf32>
    %c0_5 = arith.constant 0 : index
    %c0_6 = arith.constant 0 : index
    %8 = vector.load %arg5[%c0_5, %c0_6] : memref<1x128xf32, #tpu.memory_space<vmem>>, vector<1x128xf32>
    %9 = vector.broadcast %8 : vector<1x128xf32> to vector<128x128xf32>
    %10 = arith.addf %7, %9 : vector<128x128xf32>
    %cst = arith.constant 0.000000e+00 : f32
    %11 = vector.broadcast %cst : f32 to vector<128x128xf32>
    %12 = arith.cmpf ogt, %10, %11 : vector<128x128xf32>
    %cst_7 = arith.constant 0.00999999977 : f32
    %13 = vector.broadcast %cst_7 : f32 to vector<128x128xf32>
    %14 = arith.mulf %13, %10 : vector<128x128xf32>
    %15 = arith.select %12, %10, %14 : vector<128x128xi1>, vector<128x128xf32>
    %16 = arith.truncf %15 : vector<128x128xf32> to vector<128x128xbf16>
    %c0_8 = arith.constant 0 : index
    %c0_9 = arith.constant 0 : index
    %17 = vector.load %arg6[%c0_8, %c0_9] : memref<128x128xbf16, #tpu.memory_space<vmem>>, vector<128x128xbf16>
    %cst_10 = arith.constant dense<0.000000e+00> : vector<128x128xf32>
    %18 = tpu.matmul %16, %17, %cst_10 {dimension_numbers = #tpu.dot_dimension_numbers<[1], [0], [0], [1], [0, 0, 1, 1], [], []>} : vector<128x128xbf16>, vector<128x128xbf16>, vector<128x128xf32> -> vector<128x128xf32>
    %c0_11 = arith.constant 0 : index
    %c0_12 = arith.constant 0 : index
    %19 = vector.load %arg7[%c0_11, %c0_12] : memref<1x128xf32, #tpu.memory_space<vmem>>, vector<1x128xf32>
    %20 = vector.broadcast %19 : vector<1x128xf32> to vector<128x128xf32>
    %21 = arith.addf %18, %20 : vector<128x128xf32>
    %cst_13 = arith.constant 0.000000e+00 : f32
    %22 = vector.broadcast %cst_13 : f32 to vector<128x128xf32>
    %23 = arith.cmpf ogt, %21, %22 : vector<128x128xf32>
    %cst_14 = arith.constant 0.00999999977 : f32
    %24 = vector.broadcast %cst_14 : f32 to vector<128x128xf32>
    %25 = arith.mulf %24, %21 : vector<128x128xf32>
    %26 = arith.select %23, %21, %25 : vector<128x128xi1>, vector<128x128xf32>
    %27 = arith.truncf %26 : vector<128x128xf32> to vector<128x128xbf16>
    %c0_15 = arith.constant 0 : index
    %c0_16 = arith.constant 0 : index
    %28 = vector.load %arg8[%c0_15, %c0_16] : memref<128x128xbf16, #tpu.memory_space<vmem>>, vector<128x128xbf16>
    %cst_17 = arith.constant dense<0.000000e+00> : vector<128x128xf32>
    %29 = tpu.matmul %27, %28, %cst_17 {dimension_numbers = #tpu.dot_dimension_numbers<[1], [0], [0], [1], [0, 0, 1, 1], [], []>} : vector<128x128xbf16>, vector<128x128xbf16>, vector<128x128xf32> -> vector<128x128xf32>
    %c0_18 = arith.constant 0 : index
    %c0_19 = arith.constant 0 : index
    %30 = vector.load %arg2[%c0_18, %c0_19] : memref<128x128xbf16, #tpu.memory_space<vmem>>, vector<128x128xbf16>
    %31 = arith.extf %30 : vector<128x128xbf16> to vector<128x128xf32>
    %c0_20 = arith.constant 0 : index
    %c0_21 = arith.constant 0 : index
    %32 = vector.load %arg9[%c0_20, %c0_21] : memref<1x128xf32, #tpu.memory_space<vmem>>, vector<1x128xf32>
    %33 = vector.broadcast %0 : vector<128x1xf32> to vector<128x128xf32>
    %34 = vector.broadcast %32 : vector<1x128xf32> to vector<128x128xf32>
    %35 = arith.mulf %33, %34 : vector<128x128xf32>
    %36 = arith.addf %31, %35 : vector<128x128xf32>
    %c0_22 = arith.constant 0 : index
    %c0_23 = arith.constant 0 : index
    %37 = vector.load %arg10[%c0_22, %c0_23] : memref<1x128xf32, #tpu.memory_space<vmem>>, vector<1x128xf32>
    %38 = vector.broadcast %37 : vector<1x128xf32> to vector<128x128xf32>
    %39 = arith.addf %36, %38 : vector<128x128xf32>
    %cst_24 = arith.constant 0.000000e+00 : f32
    %40 = vector.broadcast %cst_24 : f32 to vector<128x128xf32>
    %41 = arith.cmpf ogt, %39, %40 : vector<128x128xf32>
    %cst_25 = arith.constant 0.00999999977 : f32
    %42 = vector.broadcast %cst_25 : f32 to vector<128x128xf32>
    %43 = arith.mulf %42, %39 : vector<128x128xf32>
    %44 = arith.select %41, %39, %43 : vector<128x128xi1>, vector<128x128xf32>
    %45 = arith.truncf %44 : vector<128x128xf32> to vector<128x128xbf16>
    %c0_26 = arith.constant 0 : index
    %c0_27 = arith.constant 0 : index
    %46 = vector.load %arg11[%c0_26, %c0_27] : memref<128x128xbf16, #tpu.memory_space<vmem>>, vector<128x128xbf16>
    %cst_28 = arith.constant dense<0.000000e+00> : vector<128x128xf32>
    %47 = tpu.matmul %45, %46, %cst_28 {dimension_numbers = #tpu.dot_dimension_numbers<[1], [0], [0], [1], [0, 0, 1, 1], [], []>} : vector<128x128xbf16>, vector<128x128xbf16>, vector<128x128xf32> -> vector<128x128xf32>
    %c0_29 = arith.constant 0 : index
    %c0_30 = arith.constant 0 : index
    %48 = vector.load %arg12[%c0_29, %c0_30] : memref<1x128xf32, #tpu.memory_space<vmem>>, vector<1x128xf32>
    %49 = vector.broadcast %48 : vector<1x128xf32> to vector<128x128xf32>
    %50 = arith.addf %47, %49 : vector<128x128xf32>
    %cst_31 = arith.constant 0.000000e+00 : f32
    %51 = vector.broadcast %cst_31 : f32 to vector<128x128xf32>
    %52 = arith.cmpf ogt, %50, %51 : vector<128x128xf32>
    %cst_32 = arith.constant 0.00999999977 : f32
    %53 = vector.broadcast %cst_32 : f32 to vector<128x128xf32>
    %54 = arith.mulf %53, %50 : vector<128x128xf32>
    %55 = arith.select %52, %50, %54 : vector<128x128xi1>, vector<128x128xf32>
    %56 = arith.truncf %55 : vector<128x128xf32> to vector<128x128xbf16>
    %c0_33 = arith.constant 0 : index
    %c0_34 = arith.constant 0 : index
    %57 = vector.load %arg13[%c0_33, %c0_34] : memref<128x128xbf16, #tpu.memory_space<vmem>>, vector<128x128xbf16>
    %cst_35 = arith.constant dense<0.000000e+00> : vector<128x128xf32>
    %58 = tpu.matmul %56, %57, %cst_35 {dimension_numbers = #tpu.dot_dimension_numbers<[1], [0], [0], [1], [0, 0, 1, 1], [], []>} : vector<128x128xbf16>, vector<128x128xbf16>, vector<128x128xf32> -> vector<128x128xf32>
    %59 = arith.addf %29, %58 : vector<128x128xf32>
    %c0_36 = arith.constant 0 : index
    %c0_37 = arith.constant 0 : index
    %60 = vector.load %arg14[%c0_36, %c0_37] : memref<1x128xf32, #tpu.memory_space<vmem>>, vector<1x128xf32>
    %61 = vector.broadcast %60 : vector<1x128xf32> to vector<128x128xf32>
    %62 = arith.addf %59, %61 : vector<128x128xf32>
    %63 = tpu.transpose %62, [1, 0] : vector<128x128xf32> -> vector<128x128xf32>
    %64 = vector.extract_strided_slice %63 {offsets = [0, 0], sizes = [1, 128], strides = [1, 1]} : vector<128x128xf32> to vector<1x128xf32>
    %c0_38 = arith.constant 0 : index
    %c0_39 = arith.constant 0 : index
    %65 = vector.load %arg15[%c0_38, %c0_39] : memref<1x128xf32, #tpu.memory_space<vmem>>, vector<1x128xf32>
    tpu.vector_store %arg15[%c0_38, %c0_39], %64 {strides = array<i32>} : memref<1x128xf32, #tpu.memory_space<vmem>>, vector<1x128xf32>,
    return
  }
  func.func @transform_0(%arg0: i32) -> (i32, i32) {
    %c0_i32 = arith.constant 0 : i32
    %c0_i32_0 = arith.constant 0 : i32
    return %arg0, %c0_i32 : i32, i32
  }
  func.func @transform_1(%arg0: i32) -> (i32, i32) {
    %c0_i32 = arith.constant 0 : i32
    %c0_i32_0 = arith.constant 0 : i32
    return %arg0, %c0_i32 : i32, i32
  }
  func.func @transform_2(%arg0: i32) -> (i32, i32) {
    %c0_i32 = arith.constant 0 : i32
    %c0_i32_0 = arith.constant 0 : i32
    return %arg0, %c0_i32 : i32, i32
  }
  func.func @transform_3(%arg0: i32) -> (i32, i32) {
    %c0_i32 = arith.constant 0 : i32
    %c0_i32_0 = arith.constant 0 : i32
    %c0_i32_1 = arith.constant 0 : i32
    return %c0_i32, %c0_i32_0 : i32, i32
  }
  func.func @transform_4(%arg0: i32) -> (i32, i32) {
    %c0_i32 = arith.constant 0 : i32
    %c0_i32_0 = arith.constant 0 : i32
    %c0_i32_1 = arith.constant 0 : i32
    return %c0_i32, %c0_i32_0 : i32, i32
  }
  func.func @transform_5(%arg0: i32) -> (i32, i32) {
    %c0_i32 = arith.constant 0 : i32
    %c0_i32_0 = arith.constant 0 : i32
    %c0_i32_1 = arith.constant 0 : i32
    return %c0_i32, %c0_i32_0 : i32, i32
  }
  func.func @transform_6(%arg0: i32) -> (i32, i32) {
    %c0_i32 = arith.constant 0 : i32
    %c0_i32_0 = arith.constant 0 : i32
    %c0_i32_1 = arith.constant 0 : i32
    return %c0_i32, %c0_i32_0 : i32, i32
  }
  func.func @transform_7(%arg0: i32) -> (i32, i32) {
    %c0_i32 = arith.constant 0 : i32
    %c0_i32_0 = arith.constant 0 : i32
    %c0_i32_1 = arith.constant 0 : i32
    return %c0_i32, %c0_i32_0 : i32, i32
  }
  func.func @transform_8(%arg0: i32) -> (i32, i32) {
    %c0_i32 = arith.constant 0 : i32
    %c0_i32_0 = arith.constant 0 : i32
    %c0_i32_1 = arith.constant 0 : i32
    return %c0_i32, %c0_i32_0 : i32, i32
  }
  func.func @transform_9(%arg0: i32) -> (i32, i32) {
    %c0_i32 = arith.constant 0 : i32
    %c0_i32_0 = arith.constant 0 : i32
    %c0_i32_1 = arith.constant 0 : i32
    return %c0_i32, %c0_i32_0 : i32, i32
  }
  func.func @transform_10(%arg0: i32) -> (i32, i32) {
    %c0_i32 = arith.constant 0 : i32
    %c0_i32_0 = arith.constant 0 : i32
    %c0_i32_1 = arith.constant 0 : i32
    return %c0_i32, %c0_i32_0 : i32, i32
  }
  func.func @transform_11(%arg0: i32) -> (i32, i32) {
    %c0_i32 = arith.constant 0 : i32
    %c0_i32_0 = arith.constant 0 : i32
    %c0_i32_1 = arith.constant 0 : i32
    return %c0_i32, %c0_i32_0 : i32, i32
  }
  func.func @transform_12(%arg0: i32) -> (i32, i32) {
    %c0_i32 = arith.constant 0 : i32
    %c0_i32_0 = arith.constant 0 : i32
    %c0_i32_1 = arith.constant 0 : i32
    return %c0_i32, %c0_i32_0 : i32, i32
  }
  func.func @transform_13(%arg0: i32) -> (i32, i32) {
    %c0_i32 = arith.constant 0 : i32
    %c0_i32_0 = arith.constant 0 : i32
    %c0_i32_1 = arith.constant 0 : i32
    return %c0_i32, %c0_i32_0 : i32, i32
  }
  func.func @transform_14(%arg0: i32) -> (i32, i32) {
    %c0_i32 = arith.constant 0 : i32
    %c0_i32_0 = arith.constant 0 : i32
    return %c0_i32, %arg0 : i32, i32
  }
}

</mosaic_0001>

<bundles_post_ra>
// kernel: tpu_custom_call.1
= control target key start
LH: loop header
LB: loop body
LE: loop exit
PB: predicated region body
PF: predicated region fallthrough
CT: control target
= control target key end

     0   :  { %19 = vsyncpa [#allocation3], 0  ;;  %s2092_s0 = inlined_call_operand.vmem [shape: bf16[128,128], index: 0, kind: input, shape index: {}]   ;;  %s2093_s1 = inlined_call_operand.vmem [shape: bf16[128,128], index: 1, kind: input, shape index: {}]   ;;  %s2094_s2 = inlined_call_operand.vmem [shape: f32[128,1], index: 2, kind: input, shape index: {}]   ;;  %s2095_s3 = inlined_call_operand.vmem [shape: f32[1,128], index: 3, kind: input, shape index: {}]   ;;  %s2096_s4 = inlined_call_operand.vmem [shape: f32[1,128], index: 4, kind: input, shape index: {}]   ;;  %s2097_s5 = inlined_call_operand.hbm [shape: bf16[128,128], index: 5, kind: input, shape index: {}]   ;;  %s2098_s6 = inlined_call_operand.vmem [shape: f32[1,128], index: 6, kind: input, shape index: {}]   ;;  %s2099_s7 = inlined_call_operand.hbm [shape: bf16[128,128], index: 7, kind: input, shape index: {}]   ;;  %s2100_s8 = inlined_call_operand.vmem [shape: f32[1,128], index: 8, kind: input, shape index: {}]   ;;  %s2101_s9 = inlined_call_operand.vmem [shape: f32[1,128], index: 9, kind: input, shape index: {}]   ;;  %s2102_s10 = inlined_call_operand.hbm [shape: bf16[128,128], index: 10, kind: input, shape index: {}]   ;;  %s2103_s11 = inlined_call_operand.vmem [shape: f32[1,128], index: 11, kind: input, shape index: {}]   ;;  %s2104_s12 = inlined_call_operand.hbm [shape: bf16[128,128], index: 12, kind: input, shape index: {}]   ;;  %s2105_s13 = inlined_call_operand.vmem [shape: f32[1,128], index: 13, kind: input, shape index: {}]   ;;  %s2106_s14 = inlined_call_operand.hbm [shape: f32[1,128], index: 14, kind: output, shape index: {}]  }
   0x1   :  { %20 = vsyncpa [#allocation6], 0 }
   0x2   :  { %21 = vsyncpa [#allocation9], 0 }
   0x3   :  { %22 = vsyncpa [#allocation4], 0  ;;  %s52_s15 = sshll.u32 %s2099_s7, 4  ;;  %s1523_s16 = smov [#allocation5]   ;;  %s53_s15 = int_to_ptr.hbm [resolvable:$true] %s52_s15 }
   0x4   :  { %s54_s17 = sshll.u32 %s1523_s16, 4  ;;  %s37_s20 = sshll.u32 %s2097_s5, 4  ;;  %s55_s17 = int_to_ptr.vmem [resolvable:$true] %s54_s17  ;;  %s38_s20 = int_to_ptr.hbm [resolvable:$true] %s37_s20 }
   0x5   :  { %s1524_s21 = smov 64   ;;  %s1525_s22 = smov 4  }
   0x6   :  { %60 = dma.hbm_to_vmem [thread:$0]  %s53_s15, 1024, %s55_s17, [#allocation6], %s1524_s21, %s1524_s21, %s1525_s22  }
   0x7   :  { %s1526_s23 = smov [#allocation2]   ;;  %s69_s27 = sshll.u32 %s2102_s10, 4  ;;  %s70_s27 = int_to_ptr.hbm [resolvable:$true] %s69_s27 }
   0x8   :  { %s39_s24 = sshll.u32 %s1526_s23, 4  ;;  %s84_s29 = sshll.u32 %s2104_s12, 4  ;;  %s40_s24 = int_to_ptr.vmem [resolvable:$true] %s39_s24  ;;  %s85_s29 = int_to_ptr.hbm [resolvable:$true] %s84_s29 }
   0x9   :  { %45 = dma.hbm_to_vmem [thread:$0]  %s38_s20, 1024, %s40_s24, [#allocation3], %s1524_s21, %s1524_s21, %s1525_s22  }
   0xa   :  { %s1527_s30 = smov [#allocation7]   ;;  %s1528_s5 = smov [#allocation8]  }
   0xb   :  { %s71_s16 = sshll.u32 %s1527_s30, 4  ;;  %s86_s15 = sshll.u32 %s1528_s5, 4  ;;  %s72_s16 = int_to_ptr.vmem [resolvable:$true] %s71_s16  ;;  %s87_s15 = int_to_ptr.vmem [resolvable:$true] %s86_s15 }
   0xc   :  { %77 = dma.hbm_to_vmem [thread:$0]  %s70_s27, 1024, %s72_s16, [#allocation6], %s1524_s21, %s1524_s21, %s1525_s22  }
   0xd   :  { %92 = dma.hbm_to_vmem [thread:$0]  %s85_s29, 1024, %s87_s15, [#allocation9], %s1524_s21, %s1524_s21, %s1525_s22  }
   0xe   :  { %1515 = dma.done.wait [#allocation3], 1024  }
   0xf   :  { %1516 = vsyncadd [#allocation3], 4294966272 }
  0x10   :  { %1517 = dma.done.wait [#allocation6], 2048  }
  0x11   :  { %1518 = vsyncadd [#allocation6], 4294965248 }
  0x12   :  { %1519 = dma.done.wait [#allocation9], 1024  }
  0x13   :  { %1520 = vsyncadd [#allocation9], 4294966272  ;;  %v1529_v0 = vmov 0   ;;  %v113_v1 = vld [vmem:[%s2094_s2 + $0x10] sm:$0xff]  ;;  %v111_v2 = vld [vmem:[%s2094_s2] sm:$0xff] }
  0x14   :  { %1386 = vset.pattern.permute.xlu1 %v1529_v0  ;;  %1385 = vset.pattern.permute.xlu0 %v1529_v0  ;;  %v115_v3 = vld [vmem:[%s2094_s2 + $0x20] sm:$0xff]  ;;  %v114_v4 = vld [vmem:[%s2094_s2 + $0x18] sm:$0xff]  ;;  %v112_v5 = vld [vmem:[%s2094_s2 + $0x8] sm:$0xff] }
  0x15   :  { %1387 = vset.pattern.permute.xlu2 %v1529_v0  ;;  %172 = vperm.xlu1 %1386, %v113_v1   ;;  %v116_v6 = vld [vmem:[%s2094_s2 + $0x28] sm:$0xff]  ;;  %v1274_v7 = vld [vmem:[#allocation2 + $0x38] sm:$0xff]  ;;  %v1273_v9 = vld [vmem:[#allocation2 + $0x30] sm:$0xff] }
  0x16   :  { %162 = vperm.xlu0 %1385, %v111_v2   ;;  %182 = vperm.xlu2 %1387, %v115_v3   ;;  %v1290_v8 = vld [vmem:[#allocation7 + $0x38] sm:$0xff]  ;;  %v1289_v10 = vld [vmem:[#allocation7 + $0x30] sm:$0xff]  ;;  %v1272_v13 = vld [vmem:[#allocation2 + $0x28] sm:$0xff] }
  0x17   :  { %419 = vmatpush.bf16.msra.mxu0 %v1274_v7  ;;  %752 = vmatpush.bf16.msra.mxu1 %v1290_v8  ;;  %v118_v11 = vld [vmem:[%s2094_s2 + $0x38] sm:$0xff]  ;;  %v117_v12 = vld [vmem:[%s2094_s2 + $0x30] sm:$0xff]  ;;  %v119_v14 = vld [vmem:[%s2094_s2 + $0x40] sm:$0xff] }
  0x18   :  { %v1288_v15 = vld [vmem:[#allocation7 + $0x28] sm:$0xff]  ;;  %v121_v16 = vld [vmem:[%s2094_s2 + $0x50] sm:$0xff]  ;;  %v122_v18 = vld [vmem:[%s2094_s2 + $0x58] sm:$0xff] }
  0x19   :  { %v120_v17 = vld [vmem:[%s2094_s2 + $0x48] sm:$0xff]  ;;  %v123_v20 = vld [vmem:[%s2094_s2 + $0x60] sm:$0xff]  ;;  %v125_v21 = vld [vmem:[%s2094_s2 + $0x70] sm:$0xff] }
  0x1a   :  { %v124_v19 = vld [vmem:[%s2094_s2 + $0x68] sm:$0xff]  ;;  %v126_v22 = vld [vmem:[%s2094_s2 + $0x78] sm:$0xff]  ;;  %v1271_v23 = vld [vmem:[#allocation2 + $0x20] sm:$0xff] }
  0x1b   :  { %420 = vmatpush.bf16.msra.mxu0 %v1273_v9  ;;  %753 = vmatpush.bf16.msra.mxu1 %v1289_v10  ;;  %v1287_v24 = vld [vmem:[#allocation7 + $0x20] sm:$0xff]  ;;  %v1270_v25 = vld [vmem:[#allocation2 + $0x18] sm:$0xff]  ;;  %v1269_v27 = vld [vmem:[#allocation2 + $0x10] sm:$0xff] }
  0x1c   :  { %v1286_v26 = vld [vmem:[#allocation7 + $0x18] sm:$0xff]  ;;  %v1285_v28 = vld [vmem:[#allocation7 + $0x10] sm:$0xff]  ;;  %v1268_v30 = vld [vmem:[#allocation2 + $0x8] sm:$0xff] }
  0x1d   :  { %177 = vperm.xlu1 %1386, %v114_v4   ;;  %v1284_v31 = vld [vmem:[#allocation7 + $0x8] sm:$0xff]  ;;  %v1267_v32 = vld [vmem:[#allocation2] sm:$0xff]  ;;  %v1691_v42 = vld [vmem:[%s2092_s0 + $0x10] sm:$0xff]  }
  0x1e   :  { %167 = vperm.xlu0 %1385, %v112_v5   ;;  %187 = vperm.xlu2 %1387, %v116_v6   ;;  %v1283_v33 = vld [vmem:[#allocation7] sm:$0xff]  ;;  %v1696_v43 = vld [vmem:[%s2093_s1 + $0x10] sm:$0xff]   ;;  %v1713_v48 = vld [vmem:[%s2092_s0 + $0x8] sm:$0xff]   ;;  %v1309_v52 = vunpack.c.l.bf16 %v1691_v42 }
  0x1f   :  { %421 = vmatpush.bf16.msra.mxu0 %v1272_v13  ;;  %754 = vmatpush.bf16.msra.mxu1 %v1288_v15  ;;  %v1669_v35 = vld [vmem:[%s2092_s0 + $0x20] sm:$0xff]   ;;  %v1718_v49 = vld [vmem:[%s2093_s1 + $0x8] sm:$0xff]   ;;  %v1341_v53 = vunpack.c.l.bf16 %v1696_v43  ;;  %v1305_v62 = vunpack.c.l.bf16 %v1713_v48  ;;  %v1753_v8 = vld [vmem:[%s2092_s0 + $0x18] sm:$0xff]   ;;  %v1342_v13 = vunpack.c.h.bf16 %v1696_v43 }
  0x20   :  { %v1674_v36 = vld [vmem:[%s2093_s1 + $0x20] sm:$0xff]   ;;  %v1317_v39 = vunpack.c.l.bf16 %v1669_v35  ;;  %v1739_v60 = vld [vmem:[%s2092_s0 + $0x28] sm:$0xff]   ;;  %v1337_v63 = vunpack.c.l.bf16 %v1718_v49  ;;  %v1338_v15 = vunpack.c.h.bf16 %v1718_v49 }
  0x21   :  { %v1679_v37 = vld [vmem:[%s2095_s3] ss:$0 sm:$0xff]  ;;  %v1349_v40 = vunpack.c.l.bf16 %v1674_v36  ;;  %v1744_v61 = vld [vmem:[%s2093_s1 + $0x28] sm:$0xff]   ;;  %v1322_v9 = vunpack.c.h.bf16 %v1739_v60 }
  0x22   :  { %v1684_v38 = vld [vmem:[%s2100_s8] ss:$0 sm:$0xff]  ;;  %v1354_v10 = vunpack.c.h.bf16 %v1744_v61 }
  0x23   :  { %422 = vmatpush.bf16.msra.mxu0 %v1271_v23  ;;  %755 = vmatpush.bf16.msra.mxu1 %v1287_v24  ;;  %v1703_v46 = vld [vmem:[%s2096_s4] ss:$0 sm:$0xff]  ;;  %v1314_v24 = vunpack.c.h.bf16 %v1753_v8  ;;  %s1127_s4 = sshll.u32 %s2106_s14, 4  ;;  %s1128_s4 = int_to_ptr.hbm [resolvable:$true] %s1127_s4 }
  0x24   :  { %v1708_v47 = vld [vmem:[%s2101_s9] ss:$0 sm:$0xff] }
  0x25   :  { %197 = vperm.xlu1 %1386, %v118_v11   ;;  %v1300_v56 = vld [vmem:[%s2092_s0] sm:$0xff]  }
  0x26   :  { %192 = vperm.xlu0 %1385, %v117_v12   ;;  %202 = vperm.xlu2 %1387, %v119_v14   ;;  %v1332_v57 = vld [vmem:[%s2093_s1] sm:$0xff]   ;;  %v1301_v2 = vunpack.c.l.bf16 %v1300_v56  ;;  %v1310_v12 = vunpack.c.h.bf16 %v1691_v42  ;;  %v1306_v14 = vunpack.c.h.bf16 %v1713_v48 }
  0x27   :  { %423 = vmatpush.bf16.msra.mxu0 %v1270_v25  ;;  %756 = vmatpush.bf16.msra.mxu1 %v1286_v26  ;;  %v1333_v3 = vunpack.c.l.bf16 %v1332_v57  ;;  %v1334_v23 = vunpack.c.h.bf16 %v1332_v57 }
  0x2b   :  { %424 = vmatpush.bf16.msra.mxu0 %v1269_v27  ;;  %757 = vmatpush.bf16.msra.mxu1 %v1285_v28 }
  0x2d   :  { %212 = vperm.xlu1 %1386, %v121_v16  }
  0x2e   :  { %207 = vperm.xlu0 %1385, %v120_v17   ;;  %217 = vperm.xlu2 %1387, %v122_v18   ;;  %v1302_v17 = vunpack.c.h.bf16 %v1300_v56  ;;  %v1765_v18 = vld [vmem:[%s2093_s1 + $0x18] sm:$0xff]  }
  0x2f   :  { %425 = vmatpush.bf16.msra.mxu0 %v1268_v30  ;;  %758 = vmatpush.bf16.msra.mxu1 %v1284_v31  ;;  %v1346_v31 = vunpack.c.h.bf16 %v1765_v18 }
  0x33   :  { %426 = vmatpush.bf16.msra.mxu0 %v1267_v32  ;;  %759 = vmatpush.bf16.msra.mxu1 %v1283_v33  ;;  %v1313_v32 = vunpack.c.l.bf16 %v1753_v8  ;;  %v1783_v33 = vld [vmem:[%s2092_s0 + $0x38] sm:$0xff]  }
  0x35   :  { %227 = vperm.xlu1 %1386, %v124_v19  }
  0x36   :  { %222 = vperm.xlu0 %1385, %v123_v20   ;;  %232 = vperm.xlu2 %1387, %v125_v21  }
  0x3e   :  { %237 = vperm.xlu0 %1385, %v126_v22  }
  0x70   :  { %v183_v29 = vpop.permute.xlu2 %182 }
  0x71   :  { %v247_v54 = vmul.f32 %v1679_v37, %v183_v29  ;;  %v580_v55 = vmul.f32 %v1684_v38, %v183_v29 }
  0x73   :  { %v263_v6 = vadd.f32 %v1309_v52, %v247_v54  ;;  %v596_v7 = vadd.f32 %v1341_v53, %v580_v55  ;;  %v1329_v53 = vunpack.c.l.bf16 %v1783_v33 }
  0x75   :  { %v1771_v25 = vadd.f32 %v1703_v46, %v263_v6  ;;  %v1774_v26 = vadd.f32 %v1708_v47, %v596_v7 }
  0x77   :  { %vm299_vm8 = vcmp.gt.f32.partialorder %v1771_v25, 0.0  ;;  %vm632_vm14 = vcmp.gt.f32.partialorder %v1774_v26, 0.0 }
  0x78   :  { %v188_v34 = vpop.permute.xlu2 %187 }
  0x79   :  { %v248_v29 = vmul.f32 %v1679_v37, %v188_v34  ;;  %v581_v30 = vmul.f32 %v1684_v38, %v188_v34 }
  0x7b   :  { %v264_v56 = vadd.f32 %v1310_v12, %v248_v29  ;;  %v597_v57 = vadd.f32 %v1342_v13, %v581_v30 }
  0x80   :  { %v203_v41 = vpop.permute.xlu2 %202 }
  0x81   :  { %v251_v44 = vmul.f32 %v1679_v37, %v203_v41  ;;  %v584_v45 = vmul.f32 %v1684_v38, %v203_v41 }
  0x83   :  { %v267_v50 = vadd.f32 %v1317_v39, %v251_v44  ;;  %v600_v51 = vadd.f32 %v1349_v40, %v584_v45  ;;  %v1788_v39 = vld [vmem:[%s2093_s1 + $0x38] sm:$0xff]  }
  0x84   :  { %v1361_v54 = vunpack.c.l.bf16 %v1788_v39 }
  0x85   :  { %v1731_v58 = vadd.f32 %v1703_v46, %v267_v50  ;;  %v1734_v59 = vadd.f32 %v1708_v47, %v600_v51 }
  0x87   :  { %v173_v0 = vpop.permute.xlu1 %172  ;;  %vm303_vm10 = vcmp.gt.f32.partialorder %v1731_v58, 0.0  ;;  %vm636_vm12 = vcmp.gt.f32.partialorder %v1734_v59, 0.0 }
  0x88   :  { %v163_v1 = vpop.permute.xlu0 %162  ;;  %v218_v11 = vpop.permute.xlu2 %217  ;;  %v245_v16 = vmul.f32 %v1679_v37, %v173_v0  ;;  %v578_v41 = vmul.f32 %v1684_v38, %v173_v0 }
  0x89   :  { %v243_v4 = vmul.f32 %v1679_v37, %v163_v1  ;;  %v576_v5 = vmul.f32 %v1684_v38, %v163_v1  ;;  %v254_v19 = vmul.f32 %v1679_v37, %v218_v11  ;;  %v587_v20 = vmul.f32 %v1684_v38, %v218_v11 }
  0x8a   :  { %v261_v40 = vadd.f32 %v1305_v62, %v245_v16 }
  0x8b   :  { %v259_v21 = vadd.f32 %v1301_v2, %v243_v4  ;;  %v592_v22 = vadd.f32 %v1333_v3, %v576_v5  ;;  %v270_v27 = vadd.f32 %v1322_v9, %v254_v19  ;;  %v603_v28 = vadd.f32 %v1354_v10, %v587_v20 }
  0x8c   :  { %v281_v1 = vadd.f32 %v1703_v46, %v261_v40  ;;  %v594_v2 = vadd.f32 %v1337_v63, %v578_v41  ;;  %v1832_v40 = vld [vmem:[%s2092_s0 + $0x30] sm:$0xff]  }
  0x8d   :  { %v1792_v34 = vadd.f32 %v1703_v46, %v270_v27  ;;  %v1795_v44 = vadd.f32 %v1708_v47, %v603_v28  ;;  %v279_v45 = vadd.f32 %v1703_v46, %v259_v21  ;;  %v612_v48 = vadd.f32 %v1708_v47, %v592_v22  ;;  %v1837_v41 = vld [vmem:[%s2093_s1 + $0x30] sm:$0xff]  }
  0x8e   :  { %v1823_v22 = vadd.f32 %v1708_v47, %v597_v57  ;;  %v1358_v57 = vunpack.c.h.bf16 %v1837_v41  ;;  %vm297_vm4 = vcmp.gt.f32.partialorder %v281_v1, 0.0 }
  0x8f   :  { %v178_v42 = vpop.permute.xlu1 %177  ;;  %v311_v7 = vmul.f32 0.01, %v279_v45  ;;  %v644_v9 = vmul.f32 0.01, %v612_v48  ;;  %vm295_vm2 = vcmp.gt.f32.partialorder %v279_v45, 0.0  ;;  %vm628_vm3 = vcmp.gt.f32.partialorder %v612_v48, 0.0 }
  0x90   :  { %v168_v43 = vpop.permute.xlu0 %167  ;;  %v246_v51 = vmul.f32 %v1679_v37, %v178_v42  ;;  %v579_v52 = vmul.f32 %v1684_v38, %v178_v42  ;;  %v233_v55 = vpop.permute.xlu2 %232 }
  0x91   :  { %v244_v49 = vmul.f32 %v1679_v37, %v168_v43  ;;  %v577_v50 = vmul.f32 %v1684_v38, %v168_v43  ;;  %v257_v3 = vmul.f32 %v1679_v37, %v233_v55  ;;  %v590_v4 = vmul.f32 %v1684_v38, %v233_v55 }
  0x92   :  { %v262_v10 = vadd.f32 %v1306_v14, %v246_v51  ;;  %v595_v11 = vadd.f32 %v1338_v15, %v579_v52  ;;  %v614_v14 = vadd.f32 %v1708_v47, %v594_v2  ;;  %v1820_v15 = vadd.f32 %v1703_v46, %v264_v56 }
  0x93   :  { %v260_v62 = vadd.f32 %v1302_v17, %v244_v49  ;;  %v593_v0 = vadd.f32 %v1334_v23, %v577_v50  ;;  %v273_v16 = vadd.f32 %v1329_v53, %v257_v3  ;;  %v606_v12 = vadd.f32 %v1361_v54, %v590_v4 }
  0x94   :  { %v1345_v23 = vunpack.c.l.bf16 %v1765_v18  ;;  %v282_v27 = vadd.f32 %v1703_v46, %v262_v10  ;;  %v615_v28 = vadd.f32 %v1708_v47, %v595_v11  ;;  %v327_v42 = vsel %vm295_vm2, %v279_v45, %v311_v7 }
  0x95   :  { %v280_v5 = vadd.f32 %v1703_v46, %v260_v62  ;;  %v613_v6 = vadd.f32 %v1708_v47, %v593_v0  ;;  %v1813_v20 = vadd.f32 %v1703_v46, %v273_v16  ;;  %v1816_v21 = vadd.f32 %v1708_v47, %v606_v12 }
  0x96   :  { %v660_v43 = vsel %vm628_vm3, %v612_v48, %v644_v9  ;;  %v1321_v49 = vunpack.c.l.bf16 %v1739_v60  ;;  %v1353_v50 = vunpack.c.l.bf16 %v1744_v61  ;;  %v1318_v53 = vunpack.c.h.bf16 %v1669_v35 }
  0x97   :  { %vm296_vm0 = vcmp.gt.f32.partialorder %v280_v5, 0.0  ;;  %v312_v13 = vmul.f32 0.01, %v280_v5  ;;  %vm629_vm1 = vcmp.gt.f32.partialorder %v613_v6, 0.0  ;;  %v645_v17 = vmul.f32 0.01, %v613_v6  ;;  %v198_v19 = vpop.permute.xlu1 %197 }
  0x98   :  { %v1810_v63 = vpop.permute.xlu0 %192  ;;  %v313_v54 = vmul.f32 0.01, %v281_v1  ;;  %v1350_v55 = vunpack.c.h.bf16 %v1674_v36  ;;  %v1326_v56 = vunpack.c.h.bf16 %v1832_v40  ;;  %v1325_v45 = vunpack.c.l.bf16 %v1832_v40 }
  0x99   :  { %v328_v29 = vsel %vm296_vm0, %v280_v5, %v312_v13  ;;  %v661_v30 = vsel %vm629_vm1, %v613_v6, %v645_v17  ;;  %v314_v48 = vmul.f32 0.01, %v282_v27  ;;  %v646_v60 = vmul.f32 0.01, %v614_v14 }
  0x9a   :  { %v343_v51 = vpack.c.bf16 %v328_v29, %v327_v42  ;;  %v676_v52 = vpack.c.bf16 %v661_v30, %v660_v43  ;;  %v647_v62 = vmul.f32 0.01, %v615_v28  ;;  %v1357_v61 = vunpack.c.l.bf16 %v1837_v41 }
  0x9b   :  { %vm298_vm5 = vcmp.gt.f32.partialorder %v282_v27, 0.0  ;;  %vm630_vm6 = vcmp.gt.f32.partialorder %v614_v14, 0.0  ;;  %vm631_vm7 = vcmp.gt.f32.partialorder %v615_v28, 0.0  ;;  %v329_v36 = vsel %vm297_vm4, %v281_v1, %v313_v54 }
  0x9c   :  { %427 = vmatmul.bf16.vlgmr.msra.gmra.mxu0 %v343_v51  ;;  %760 = vmatmul.bf16.vlgmr.msra.gmra.mxu1 %v676_v52  ;;  %v1330_v2 = vunpack.c.h.bf16 %v1783_v33  ;;  %v1362_v3 = vunpack.c.h.bf16 %v1788_v39  ;;  %v330_v9 = vsel %vm298_vm5, %v282_v27, %v314_v48  ;;  %v662_v10 = vsel %vm630_vm6, %v614_v14, %v646_v60 }
  0x9d   :  { %v663_v11 = vsel %vm631_vm7, %v615_v28, %v647_v62  ;;  %vm300_vm9 = vcmp.gt.f32.partialorder %v1820_v15, 0.0  ;;  %v1856_v17 = vmul.f32 %v1679_v37, %v198_v19  ;;  %v1859_v29 = vmul.f32 %v1684_v38, %v198_v19 }
  0x9e   :  { %v315_v30 = vmul.f32 0.01, %v1771_v25  ;;  %v316_v40 = vmul.f32 0.01, %v1820_v15  ;;  %v1869_v42 = vmul.f32 %v1679_v37, %v1810_v63  ;;  %v1873_v19 = vmul.f32 %v1684_v38, %v1810_v63 }
  0x9f   :  { %v213_v35 = vpop.permute.xlu1 %212  ;;  %v344_v43 = vpack.c.bf16 %v330_v9, %v329_v36  ;;  %v319_v51 = vmul.f32 0.01, %v1731_v58  ;;  %v652_v9 = vmul.f32 0.01, %v1734_v59  ;;  %vm633_vm0 = vcmp.gt.f32.partialorder %v1823_v22, 0.0 }
  0xa0   :  { %v208_v0 = vpop.permute.xlu0 %207  ;;  %v253_v4 = vmul.f32 %v1679_v37, %v213_v35  ;;  %v586_v5 = vmul.f32 %v1684_v38, %v213_v35  ;;  %v1883_v54 = vsel %vm299_vm8, %v1771_v25, %v315_v30  ;;  %v1888_v63 = vsel %vm300_vm9, %v1820_v15, %v316_v40 }
  0xa1   :  { %v252_v6 = vmul.f32 %v1679_v37, %v208_v0  ;;  %v585_v7 = vmul.f32 %v1684_v38, %v208_v0  ;;  %v1898_v25 = vsel %vm303_vm10, %v1731_v58, %v319_v51  ;;  %vm306_vm1 = vcmp.gt.f32.partialorder %v1792_v34, 0.0 }
  0xa2   :  { %v269_v1 = vadd.f32 %v1321_v49, %v253_v4  ;;  %v602_v16 = vadd.f32 %v1353_v50, %v586_v5  ;;  %v677_v49 = vpack.c.bf16 %v663_v11, %v662_v10  ;;  %v1876_v50 = vmul.f32 0.01, %v1774_v26 }
  0xa3   :  { %v268_v12 = vadd.f32 %v1318_v53, %v252_v6  ;;  %v601_v13 = vadd.f32 %v1350_v55, %v585_v7  ;;  %v1891_v55 = vmul.f32 0.01, %v1823_v22  ;;  %vm639_vm3 = vcmp.gt.f32.partialorder %v1795_v44, 0.0 }
  0xa4   :  { %v289_v27 = vadd.f32 %v1703_v46, %v269_v1  ;;  %v622_v14 = vadd.f32 %v1708_v47, %v602_v16  ;;  %v655_v40 = vmul.f32 0.01, %v1795_v44  ;;  %vm309_vm8 = vcmp.gt.f32.partialorder %v1813_v20, 0.0 }
  0xa5   :  { %v288_v28 = vadd.f32 %v1703_v46, %v268_v12  ;;  %v621_v41 = vadd.f32 %v1708_v47, %v601_v13  ;;  %v322_v12 = vmul.f32 0.01, %v1792_v34  ;;  %vm642_vm10 = vcmp.gt.f32.partialorder %v1816_v21, 0.0 }
  0xa6   :  { %vm305_vm15 = vcmp.gt.f32.partialorder %v289_v27, 0.0  ;;  %vm638_vm2 = vcmp.gt.f32.partialorder %v622_v14, 0.0 }
  0xa7   :  { %vm304_vm11 = vcmp.gt.f32.partialorder %v288_v28, 0.0  ;;  %v228_v52 = vpop.permute.xlu1 %227  ;;  %v320_v48 = vmul.f32 0.01, %v288_v28  ;;  %vm637_vm13 = vcmp.gt.f32.partialorder %v621_v41, 0.0  ;;  %v653_v10 = vmul.f32 0.01, %v621_v41 }
  0xa8   :  { %v223_v53 = vpop.permute.xlu0 %222  ;;  %v256_v60 = vmul.f32 %v1679_v37, %v228_v52  ;;  %v589_v62 = vmul.f32 %v1684_v38, %v228_v52 }
  0xa9   :  { %v255_v35 = vmul.f32 %v1679_v37, %v223_v53  ;;  %v588_v0 = vmul.f32 %v1684_v38, %v223_v53  ;;  %v1900_v36 = vsel %vm304_vm11, %v288_v28, %v320_v48 }
  0xaa   :  { %v272_v15 = vadd.f32 %v1326_v56, %v256_v60  ;;  %v605_v4 = vadd.f32 %v1358_v57, %v589_v62  ;;  %v347_v7 = vpack.c.bf16 %v1900_v36, %v1898_v25  ;;  %v1915_v57 = vsel %vm636_vm12, %v1734_v59, %v652_v9  ;;  %v1296_v25 = vld [vmem:[#allocation8 + $0x28] sm:$0xff] }
  0xab   :  { %v271_v5 = vadd.f32 %v1325_v45, %v255_v35  ;;  %v604_v6 = vadd.f32 %v1357_v61, %v588_v0  ;;  %v1918_v45 = vsel %vm637_vm13, %v621_v41, %v653_v10  ;;  %v321_v61 = vmul.f32 0.01, %v289_v27  ;;  %v1280_v36 = vld [vmem:[#allocation5 + $0x28] sm:$0xff] }
  0xac   :  { %v292_v58 = vadd.f32 %v1703_v46, %v272_v15  ;;  %v625_v11 = vadd.f32 %v1708_v47, %v605_v4  ;;  %432 = vmatmul.bf16.gmra.mxu0 %v344_v43  ;;  %765 = vmatmul.bf16.gmra.mxu1 %v677_v49  ;;  %v680_v16 = vpack.c.bf16 %v1918_v45, %v1915_v57  ;;  %v654_v59 = vmul.f32 0.01, %v622_v14  ;;  %v1279_v57 = vld [vmem:[#allocation5 + $0x20] sm:$0xff]  ;;  %v1294_v45 = vld [vmem:[#allocation8 + $0x18] sm:$0xff] }
  0xad   :  { %v291_v1 = vadd.f32 %v1703_v46, %v271_v5  ;;  %v624_v56 = vadd.f32 %v1708_v47, %v604_v6  ;;  %v1926_v30 = vsel %vm305_vm15, %v289_v27, %v321_v61  ;;  %v1932_v43 = vsel %vm306_vm1, %v1792_v34, %v322_v12 }
  0xae   :  { %vm308_vm5 = vcmp.gt.f32.partialorder %v292_v58, 0.0  ;;  %v348_v49 = vpack.c.bf16 %v1932_v43, %v1926_v30  ;;  %v1936_v51 = vsel %vm638_vm2, %v622_v14, %v654_v59  ;;  %v1939_v27 = vsel %vm639_vm3, %v1795_v44, %v655_v40  ;;  %v1297_v59 = vld [vmem:[#allocation8 + $0x30] sm:$0xff]  ;;  %v1276_v43 = vld [vmem:[#allocation5 + $0x8] sm:$0xff] }
  0xaf   :  { %vm307_vm4 = vcmp.gt.f32.partialorder %v291_v1, 0.0  ;;  %v323_v52 = vmul.f32 0.01, %v291_v1  ;;  %v324_v34 = vmul.f32 0.01, %v292_v58  ;;  %vm640_vm6 = vcmp.gt.f32.partialorder %v624_v56, 0.0 }
  0xb0   :  { %v238_v13 = vpop.permute.xlu0 %237  ;;  %vm641_vm7 = vcmp.gt.f32.partialorder %v625_v11, 0.0  ;;  %v656_v14 = vmul.f32 0.01, %v624_v56  ;;  %v657_v33 = vmul.f32 0.01, %v625_v11  ;;  %v664_v35 = vsel %vm632_vm14, %v1774_v26, %v1876_v50  ;;  %v1281_v40 = vld [vmem:[#allocation5 + $0x30] sm:$0xff] }
  0xb1   :  { %v258_v28 = vmul.f32 %v1679_v37, %v238_v13  ;;  %v591_v41 = vmul.f32 %v1684_v38, %v238_v13  ;;  %v681_v38 = vpack.c.bf16 %v1939_v27, %v1936_v51  ;;  %v1947_v48 = vsel %vm307_vm4, %v291_v1, %v323_v52  ;;  %v1293_v30 = vld [vmem:[#allocation8 + $0x10] sm:$0xff]  ;;  %v1275_v51 = vld [vmem:[#allocation5] sm:$0xff] }
  0xb2   :  { %v1951_v62 = vsel %vm308_vm5, %v292_v58, %v324_v34  ;;  %v1963_v0 = vsel %vm641_vm7, %v625_v11, %v657_v33  ;;  %v658_v5 = vmul.f32 0.01, %v1816_v21  ;;  %v665_v6 = vsel %vm633_vm0, %v1823_v22, %v1891_v55 }
  0xb3   :  { %v274_v53 = vadd.f32 %v1330_v2, %v258_v28  ;;  %v607_v37 = vadd.f32 %v1362_v3, %v591_v41  ;;  %v349_v39 = vpack.c.bf16 %v1951_v62, %v1947_v48  ;;  %v1955_v2 = vsel %vm640_vm6, %v624_v56, %v656_v14  ;;  %v1277_v28 = vld [vmem:[#allocation5 + $0x10] sm:$0xff]  ;;  %v1292_v41 = vld [vmem:[#allocation8 + $0x8] sm:$0xff] }
  0xb4   :  { %v325_v3 = vmul.f32 0.01, %v1813_v20  ;;  %v682_v4 = vpack.c.bf16 %v1963_v0, %v1955_v2  ;;  %v1981_v58 = vsel %vm642_vm10, %v1816_v21, %v658_v5  ;;  %v265_v1 = vadd.f32 %v1313_v32, %v1869_v42 }
  0xb5   :  { %v294_v60 = vadd.f32 %v1703_v46, %v274_v53  ;;  %v627_v44 = vadd.f32 %v1708_v47, %v607_v37  ;;  %v345_v22 = vpack.c.bf16 %v1888_v63, %v1883_v54  ;;  %v266_v56 = vadd.f32 %v1314_v24, %v1856_v17  ;;  %v2029_v53 = vld [vmem:[%s2098_s6] ss:$0 sm:$0xff] }
  0xb6   :  { %v1974_v9 = vsel %vm309_vm8, %v1813_v20, %v325_v3  ;;  %v678_v20 = vpack.c.bf16 %v665_v6, %v664_v35  ;;  %v599_v21 = vadd.f32 %v1346_v31, %v1859_v29  ;;  %v598_v61 = vadd.f32 %v1345_v23, %v1873_v19  ;;  %v2034_v37 = vld [vmem:[%s2103_s11] ss:$0 sm:$0xff] }
  0xb7   :  { %vm310_vm9 = vcmp.gt.f32.partialorder %v294_v60, 0.0  ;;  %v326_v15 = vmul.f32 0.01, %v294_v60  ;;  %vm643_vm11 = vcmp.gt.f32.partialorder %v627_v44, 0.0  ;;  %v659_v50 = vmul.f32 0.01, %v627_v44 }
  0xb8   :  { %v285_v32 = vadd.f32 %v1703_v46, %v265_v1  ;;  %v286_v42 = vadd.f32 %v1703_v46, %v266_v56  ;;  %v619_v54 = vadd.f32 %v1708_v47, %v599_v21  ;;  %v618_v63 = vadd.f32 %v1708_v47, %v598_v61  ;;  %v1298_v46 = vld [vmem:[#allocation8 + $0x38] sm:$0xff] }
  0xb9   :  { %v1976_v26 = vsel %vm310_vm9, %v294_v60, %v326_v15  ;;  %v1983_v11 = vsel %vm643_vm11, %v627_v44, %v659_v50  ;;  %v1282_v47 = vld [vmem:[#allocation5 + $0x38] sm:$0xff]  ;;  %921 = vmatpush.bf16.msra.mxu2 %v1298_v46 }
  0xba   :  { %v350_v10 = vpack.c.bf16 %v1976_v26, %v1974_v9  ;;  %v683_v55 = vpack.c.bf16 %v1983_v11, %v1981_v58  ;;  %v317_v8 = vmul.f32 0.01, %v285_v32  ;;  %v318_v24 = vmul.f32 0.01, %v286_v42  ;;  %1018 = vmatpush.bf16.msra.mxu3 %v1282_v47 }
  0xbb   :  { %v650_v17 = vmul.f32 0.01, %v618_v63  ;;  %v651_v12 = vmul.f32 0.01, %v619_v54  ;;  %vm301_vm12 = vcmp.gt.f32.partialorder %v285_v32, 0.0  ;;  %vm302_vm13 = vcmp.gt.f32.partialorder %v286_v42, 0.0 }
  0xbc   :  { %437 = vmatmul.bf16.gmra.mxu0 %v345_v22  ;;  %770 = vmatmul.bf16.gmra.mxu1 %v678_v20  ;;  %vm634_vm14 = vcmp.gt.f32.partialorder %v618_v63, 0.0  ;;  %vm635_vm15 = vcmp.gt.f32.partialorder %v619_v54, 0.0  ;;  %v333_v18 = vsel %vm301_vm12, %v285_v32, %v317_v8  ;;  %v334_v31 = vsel %vm302_vm13, %v286_v42, %v318_v24 }
  0xbd   :  { %v666_v23 = vsel %vm634_vm14, %v618_v63, %v650_v17  ;;  %v667_v29 = vsel %vm635_vm15, %v619_v54, %v651_v12  ;;  %v346_v19 = vpack.c.bf16 %v334_v31, %v333_v18  ;;  %922 = vmatpush.bf16.msra.mxu2 %v1297_v59 }
  0xbe   :  { %v679_v13 = vpack.c.bf16 %v667_v29, %v666_v23  ;;  %1019 = vmatpush.bf16.msra.mxu3 %v1281_v40 }
  0xc1   :  { %923 = vmatpush.bf16.msra.mxu2 %v1296_v25 }
  0xc2   :  { %1020 = vmatpush.bf16.msra.mxu3 %v1280_v36 }
  0xc6   :  { %1021 = vmatpush.bf16.msra.mxu3 %v1279_v57 }
  0xcc   :  { %442 = vmatmul.bf16.gmra.mxu0 %v346_v19  ;;  %775 = vmatmul.bf16.gmra.mxu1 %v679_v13 }
  0xdc   :  { %447 = vmatmul.bf16.gmra.mxu0 %v347_v7  ;;  %780 = vmatmul.bf16.gmra.mxu1 %v680_v16  ;;  %v1295_v7 = vld [vmem:[#allocation8 + $0x20] sm:$0xff]  ;;  %v1278_v16 = vld [vmem:[#allocation5 + $0x18] sm:$0xff] }
  0xdd   :  { %924 = vmatpush.bf16.msra.mxu2 %v1295_v7  ;;  %1022 = vmatpush.bf16.msra.mxu3 %v1278_v16 }
  0xe1   :  { %925 = vmatpush.bf16.msra.mxu2 %v1294_v45  ;;  %1023 = vmatpush.bf16.msra.mxu3 %v1277_v28 }
  0xe5   :  { %926 = vmatpush.bf16.msra.mxu2 %v1293_v30  ;;  %1024 = vmatpush.bf16.msra.mxu3 %v1276_v43 }
  0xe9   :  { %927 = vmatpush.bf16.msra.mxu2 %v1292_v41  ;;  %1025 = vmatpush.bf16.msra.mxu3 %v1275_v51 }
  0xec   :  { %452 = vmatmul.bf16.gmra.mxu0 %v348_v49  ;;  %785 = vmatmul.bf16.gmra.mxu1 %v681_v38  ;;  %v1291_v49 = vld [vmem:[#allocation8] sm:$0xff] }
  0xed   :  { %928 = vmatpush.bf16.msra.mxu2 %v1291_v49 }
  0xfc   :  { %457 = vmatmul.bf16.gmra.mxu0 %v349_v39  ;;  %790 = vmatmul.bf16.gmra.mxu1 %v682_v4 }
 0x10c   :  { %462 = vmatmul.bf16.gmra.mxu0 %v350_v10  ;;  %795 = vmatmul.bf16.gmra.mxu1 %v683_v55 }
 0x119   :  { %v428_v27 = vpop.f32.mrf.mxu0  ;;  %v761_v52 = vpop.f32.mrf.mxu1 }
 0x11a   :  { %v429_v38 = vadd.f32 %v2029_v53, %v428_v27  ;;  %v762_v34 = vadd.f32 %v2034_v37, %v761_v52 }
 0x11c   :  { %v484_v60 = vmul.f32 0.01, %v429_v38  ;;  %v817_v44 = vmul.f32 0.01, %v762_v34  ;;  %vm801_vm0 = vcmp.gt.f32.partialorder %v762_v34, 0.0  ;;  %vm468_vm1 = vcmp.gt.f32.partialorder %v429_v38, 0.0 }
 0x11e   :  { %v833_v3 = vsel %vm801_vm0, %v762_v34, %v817_v44  ;;  %v500_v0 = vsel %vm468_vm1, %v429_v38, %v484_v60 }
 0x121   :  { %v430_v48 = vpop.f32.mrf.mxu0  ;;  %v763_v14 = vpop.f32.mrf.mxu1 }
 0x122   :  { %v431_v62 = vadd.f32 %v2029_v53, %v430_v48  ;;  %v764_v33 = vadd.f32 %v2034_v37, %v763_v14 }
 0x124   :  { %v485_v39 = vmul.f32 0.01, %v431_v62  ;;  %v818_v2 = vmul.f32 0.01, %v764_v33  ;;  %vm802_vm2 = vcmp.gt.f32.partialorder %v764_v33, 0.0  ;;  %vm469_vm3 = vcmp.gt.f32.partialorder %v431_v62, 0.0 }
 0x126   :  { %v834_v35 = vsel %vm802_vm2, %v764_v33, %v818_v2  ;;  %v501_v15 = vsel %vm469_vm3, %v431_v62, %v485_v39 }
 0x127   :  { %v849_v4 = vpack.c.bf16 %v834_v35, %v833_v3  ;;  %v516_v5 = vpack.c.bf16 %v501_v15, %v500_v0 }
 0x129   :  { %v433_v6 = vpop.f32.mrf.mxu0  ;;  %v766_v9 = vpop.f32.mrf.mxu1  ;;  %929 = vmatmul.bf16.vlgmr.msra.gmra.mxu2 %v849_v4  ;;  %1026 = vmatmul.bf16.vlgmr.msra.gmra.mxu3 %v516_v5 }
 0x12a   :  { %v434_v26 = vadd.f32 %v2029_v53, %v433_v6  ;;  %v767_v50 = vadd.f32 %v2034_v37, %v766_v9 }
 0x12c   :  { %v486_v11 = vmul.f32 0.01, %v434_v26  ;;  %v819_v1 = vmul.f32 0.01, %v767_v50  ;;  %vm803_vm4 = vcmp.gt.f32.partialorder %v767_v50, 0.0  ;;  %vm470_vm5 = vcmp.gt.f32.partialorder %v434_v26, 0.0 }
 0x12e   :  { %v835_v21 = vsel %vm803_vm4, %v767_v50, %v819_v1  ;;  %v502_v32 = vsel %vm470_vm5, %v434_v26, %v486_v11 }
 0x131   :  { %v435_v10 = vpop.f32.mrf.mxu0  ;;  %v768_v58 = vpop.f32.mrf.mxu1 }
 0x132   :  { %v436_v22 = vadd.f32 %v2029_v53, %v435_v10  ;;  %v769_v20 = vadd.f32 %v2034_v37, %v768_v58 }
 0x134   :  { %v487_v55 = vmul.f32 0.01, %v436_v22  ;;  %v820_v56 = vmul.f32 0.01, %v769_v20  ;;  %vm804_vm6 = vcmp.gt.f32.partialorder %v769_v20, 0.0  ;;  %vm471_vm7 = vcmp.gt.f32.partialorder %v436_v22, 0.0 }
 0x136   :  { %v836_v61 = vsel %vm804_vm6, %v769_v20, %v820_v56  ;;  %v503_v42 = vsel %vm471_vm7, %v436_v22, %v487_v55 }
 0x137   :  { %v850_v54 = vpack.c.bf16 %v836_v61, %v835_v21  ;;  %v517_v63 = vpack.c.bf16 %v503_v42, %v502_v32 }
 0x139   :  { %v438_v8 = vpop.f32.mrf.mxu0  ;;  %v771_v24 = vpop.f32.mrf.mxu1  ;;  %934 = vmatmul.bf16.gmra.mxu2 %v850_v54  ;;  %1031 = vmatmul.bf16.gmra.mxu3 %v517_v63 }
 0x13a   :  { %v439_v17 = vadd.f32 %v2029_v53, %v438_v8  ;;  %v772_v12 = vadd.f32 %v2034_v37, %v771_v24 }
 0x13c   :  { %v488_v23 = vmul.f32 0.01, %v439_v17  ;;  %v821_v29 = vmul.f32 0.01, %v772_v12  ;;  %vm805_vm8 = vcmp.gt.f32.partialorder %v772_v12, 0.0  ;;  %vm472_vm9 = vcmp.gt.f32.partialorder %v439_v17, 0.0 }
 0x13e   :  { %v837_v59 = vsel %vm805_vm8, %v772_v12, %v821_v29  ;;  %v504_v25 = vsel %vm472_vm9, %v439_v17, %v488_v23 }
 0x141   :  { %v440_v18 = vpop.f32.mrf.mxu0  ;;  %v773_v31 = vpop.f32.mrf.mxu1 }
 0x142   :  { %v441_v19 = vadd.f32 %v2029_v53, %v440_v18  ;;  %v774_v13 = vadd.f32 %v2034_v37, %v773_v31 }
 0x144   :  { %v489_v46 = vmul.f32 0.01, %v441_v19  ;;  %v822_v47 = vmul.f32 0.01, %v774_v13  ;;  %vm806_vm10 = vcmp.gt.f32.partialorder %v774_v13, 0.0  ;;  %vm473_vm11 = vcmp.gt.f32.partialorder %v441_v19, 0.0 }
 0x146   :  { %v838_v40 = vsel %vm806_vm10, %v774_v13, %v822_v47  ;;  %v505_v36 = vsel %vm473_vm11, %v441_v19, %v489_v46 }
 0x147   :  { %v851_v7 = vpack.c.bf16 %v838_v40, %v837_v59  ;;  %v518_v57 = vpack.c.bf16 %v505_v36, %v504_v25 }
 0x149   :  { %v443_v45 = vpop.f32.mrf.mxu0  ;;  %v776_v16 = vpop.f32.mrf.mxu1  ;;  %939 = vmatmul.bf16.gmra.mxu2 %v851_v7  ;;  %1036 = vmatmul.bf16.gmra.mxu3 %v518_v57 }
 0x14a   :  { %v444_v30 = vadd.f32 %v2029_v53, %v443_v45  ;;  %v777_v28 = vadd.f32 %v2034_v37, %v776_v16 }
 0x14c   :  { %v490_v49 = vmul.f32 0.01, %v444_v30  ;;  %v823_v51 = vmul.f32 0.01, %v777_v28  ;;  %vm807_vm12 = vcmp.gt.f32.partialorder %v777_v28, 0.0  ;;  %vm474_vm13 = vcmp.gt.f32.partialorder %v444_v30, 0.0 }
 0x14e   :  { %v839_v48 = vsel %vm807_vm12, %v777_v28, %v823_v51  ;;  %v506_v60 = vsel %vm474_vm13, %v444_v30, %v490_v49 }
 0x151   :  { %v445_v41 = vpop.f32.mrf.mxu0  ;;  %v778_v43 = vpop.f32.mrf.mxu1 }
 0x152   :  { %v446_v27 = vadd.f32 %v2029_v53, %v445_v41  ;;  %v779_v52 = vadd.f32 %v2034_v37, %v778_v43 }
 0x154   :  { %v491_v38 = vmul.f32 0.01, %v446_v27  ;;  %v824_v34 = vmul.f32 0.01, %v779_v52  ;;  %vm808_vm14 = vcmp.gt.f32.partialorder %v779_v52, 0.0  ;;  %vm475_vm15 = vcmp.gt.f32.partialorder %v446_v27, 0.0 }
 0x156   :  { %v840_v14 = vsel %vm808_vm14, %v779_v52, %v824_v34  ;;  %v507_v44 = vsel %vm475_vm15, %v446_v27, %v491_v38 }
 0x157   :  { %v852_v62 = vpack.c.bf16 %v840_v14, %v839_v48  ;;  %v519_v33 = vpack.c.bf16 %v507_v44, %v506_v60 }
 0x159   :  { %v448_v39 = vpop.f32.mrf.mxu0  ;;  %v781_v2 = vpop.f32.mrf.mxu1  ;;  %944 = vmatmul.bf16.gmra.mxu2 %v852_v62  ;;  %1041 = vmatmul.bf16.gmra.mxu3 %v519_v33 }
 0x15a   :  { %v449_v3 = vadd.f32 %v2029_v53, %v448_v39  ;;  %v782_v35 = vadd.f32 %v2034_v37, %v781_v2 }
 0x15c   :  { %v492_v4 = vmul.f32 0.01, %v449_v3  ;;  %v825_v5 = vmul.f32 0.01, %v782_v35  ;;  %vm809_vm0 = vcmp.gt.f32.partialorder %v782_v35, 0.0  ;;  %vm476_vm1 = vcmp.gt.f32.partialorder %v449_v3, 0.0 }
 0x15e   :  { %v841_v10 = vsel %vm809_vm0, %v782_v35, %v825_v5  ;;  %v508_v11 = vsel %vm476_vm1, %v449_v3, %v492_v4 }
 0x161   :  { %v450_v0 = vpop.f32.mrf.mxu0  ;;  %v783_v15 = vpop.f32.mrf.mxu1 }
 0x162   :  { %v451_v6 = vadd.f32 %v2029_v53, %v450_v0  ;;  %v784_v9 = vadd.f32 %v2034_v37, %v783_v15 }
 0x164   :  { %v493_v26 = vmul.f32 0.01, %v451_v6  ;;  %v826_v50 = vmul.f32 0.01, %v784_v9  ;;  %vm810_vm2 = vcmp.gt.f32.partialorder %v784_v9, 0.0  ;;  %vm477_vm3 = vcmp.gt.f32.partialorder %v451_v6, 0.0 }
 0x166   :  { %v842_v58 = vsel %vm810_vm2, %v784_v9, %v826_v50  ;;  %v509_v1 = vsel %vm477_vm3, %v451_v6, %v493_v26 }
 0x167   :  { %v853_v22 = vpack.c.bf16 %v842_v58, %v841_v10  ;;  %v520_v20 = vpack.c.bf16 %v509_v1, %v508_v11 }
 0x169   :  { %v453_v55 = vpop.f32.mrf.mxu0  ;;  %v786_v56 = vpop.f32.mrf.mxu1  ;;  %949 = vmatmul.bf16.gmra.mxu2 %v853_v22  ;;  %1046 = vmatmul.bf16.gmra.mxu3 %v520_v20 }
 0x16a   :  { %v454_v21 = vadd.f32 %v2029_v53, %v453_v55  ;;  %v787_v61 = vadd.f32 %v2034_v37, %v786_v56 }
 0x16c   :  { %v494_v54 = vmul.f32 0.01, %v454_v21  ;;  %v827_v63 = vmul.f32 0.01, %v787_v61  ;;  %vm811_vm4 = vcmp.gt.f32.partialorder %v787_v61, 0.0  ;;  %vm478_vm5 = vcmp.gt.f32.partialorder %v454_v21, 0.0 }
 0x16e   :  { %v843_v18 = vsel %vm811_vm4, %v787_v61, %v827_v63  ;;  %v510_v23 = vsel %vm478_vm5, %v454_v21, %v494_v54 }
 0x171   :  { %v455_v32 = vpop.f32.mrf.mxu0  ;;  %v788_v42 = vpop.f32.mrf.mxu1 }
 0x172   :  { %v456_v8 = vadd.f32 %v2029_v53, %v455_v32  ;;  %v789_v24 = vadd.f32 %v2034_v37, %v788_v42 }
 0x174   :  { %v495_v17 = vmul.f32 0.01, %v456_v8  ;;  %v828_v12 = vmul.f32 0.01, %v789_v24  ;;  %vm812_vm6 = vcmp.gt.f32.partialorder %v789_v24, 0.0  ;;  %vm479_vm7 = vcmp.gt.f32.partialorder %v456_v8, 0.0 }
 0x176   :  { %v844_v31 = vsel %vm812_vm6, %v789_v24, %v828_v12  ;;  %v511_v29 = vsel %vm479_vm7, %v456_v8, %v495_v17 }
 0x177   :  { %v854_v19 = vpack.c.bf16 %v844_v31, %v843_v18  ;;  %v521_v13 = vpack.c.bf16 %v511_v29, %v510_v23 }
 0x179   :  { %v458_v46 = vpop.f32.mrf.mxu0  ;;  %v791_v47 = vpop.f32.mrf.mxu1  ;;  %954 = vmatmul.bf16.gmra.mxu2 %v854_v19  ;;  %1051 = vmatmul.bf16.gmra.mxu3 %v521_v13 }
 0x17a   :  { %v459_v59 = vadd.f32 %v2029_v53, %v458_v46  ;;  %v792_v40 = vadd.f32 %v2034_v37, %v791_v47 }
 0x17c   :  { %v496_v7 = vmul.f32 0.01, %v459_v59  ;;  %v829_v57 = vmul.f32 0.01, %v792_v40  ;;  %vm813_vm8 = vcmp.gt.f32.partialorder %v792_v40, 0.0  ;;  %vm480_vm9 = vcmp.gt.f32.partialorder %v459_v59, 0.0 }
 0x17e   :  { %v845_v41 = vsel %vm813_vm8, %v792_v40, %v829_v57  ;;  %v512_v49 = vsel %vm480_vm9, %v459_v59, %v496_v7 }
 0x181   :  { %v460_v25 = vpop.f32.mrf.mxu0  ;;  %v793_v36 = vpop.f32.mrf.mxu1 }
 0x182   :  { %v461_v45 = vadd.f32 %v2029_v53, %v460_v25  ;;  %v794_v16 = vadd.f32 %v2034_v37, %v793_v36 }
 0x184   :  { %v497_v30 = vmul.f32 0.01, %v461_v45  ;;  %v830_v28 = vmul.f32 0.01, %v794_v16  ;;  %vm814_vm10 = vcmp.gt.f32.partialorder %v794_v16, 0.0  ;;  %vm481_vm11 = vcmp.gt.f32.partialorder %v461_v45, 0.0 }
 0x186   :  { %v846_v43 = vsel %vm814_vm10, %v794_v16, %v830_v28  ;;  %v513_v51 = vsel %vm481_vm11, %v461_v45, %v497_v30 }
 0x187   :  { %v855_v27 = vpack.c.bf16 %v846_v43, %v845_v41  ;;  %v522_v52 = vpack.c.bf16 %v513_v51, %v512_v49 }
 0x189   :  { %v463_v38 = vpop.f32.mrf.mxu0  ;;  %v796_v34 = vpop.f32.mrf.mxu1  ;;  %959 = vmatmul.bf16.gmra.mxu2 %v855_v27  ;;  %1056 = vmatmul.bf16.gmra.mxu3 %v522_v52 }
 0x18a   :  { %v464_v48 = vadd.f32 %v2029_v53, %v463_v38  ;;  %v797_v14 = vadd.f32 %v2034_v37, %v796_v34 }
 0x18c   :  { %v498_v62 = vmul.f32 0.01, %v464_v48  ;;  %v831_v33 = vmul.f32 0.01, %v797_v14  ;;  %vm815_vm12 = vcmp.gt.f32.partialorder %v797_v14, 0.0  ;;  %vm482_vm13 = vcmp.gt.f32.partialorder %v464_v48, 0.0 }
 0x18e   :  { %v847_v0 = vsel %vm815_vm12, %v797_v14, %v831_v33  ;;  %v514_v4 = vsel %vm482_vm13, %v464_v48, %v498_v62 }
 0x191   :  { %v465_v60 = vpop.f32.mrf.mxu0  ;;  %v798_v44 = vpop.f32.mrf.mxu1 }
 0x192   :  { %v466_v39 = vadd.f32 %v2029_v53, %v465_v60  ;;  %v799_v2 = vadd.f32 %v2034_v37, %v798_v44  ;;  %v2071_v53 = vld [vmem:[%s2105_s13] ss:$0 sm:$0xff]  ;;  %s1530_s13 = smov [#allocation10]  }
 0x193   :  { %s1125_s21 = sshll.u32 %s1530_s13, 4  ;;  %s1126_s21 = int_to_ptr.vmem [resolvable:$true] %s1125_s21 }
 0x194   :  { %v499_v3 = vmul.f32 0.01, %v466_v39  ;;  %v832_v35 = vmul.f32 0.01, %v799_v2  ;;  %vm816_vm14 = vcmp.gt.f32.partialorder %v799_v2, 0.0  ;;  %vm483_vm15 = vcmp.gt.f32.partialorder %v466_v39, 0.0 }
 0x196   :  { %v848_v15 = vsel %vm816_vm14, %v799_v2, %v832_v35  ;;  %v515_v5 = vsel %vm483_vm15, %v466_v39, %v499_v3 }
 0x197   :  { %v856_v6 = vpack.c.bf16 %v848_v15, %v847_v0  ;;  %v523_v9 = vpack.c.bf16 %v515_v5, %v514_v4 }
 0x199   :  { %964 = vmatmul.bf16.gmra.mxu2 %v856_v6  ;;  %1061 = vmatmul.bf16.gmra.mxu3 %v523_v9 }
 0x1ac   :  { %v930_v37 = vpop.f32.mrf.mxu2  ;;  %v1027_v26 = vpop.f32.mrf.mxu3 }
 0x1ad   :  { %v1028_v50 = vadd.f32 %v1027_v26, %v930_v37 }
 0x1af   :  { %v1071_v10 = vadd.f32 %v2071_v53, %v1028_v50 }
 0x1b1   :  { %1087 = vxpose.xlu1.b32.start [1/16] (narrow) %v1071_v10, 8 }
 0x1b4   :  { %v932_v58 = vpop.f32.mrf.mxu2  ;;  %v1029_v11 = vpop.f32.mrf.mxu3 }
 0x1b5   :  { %v1030_v1 = vadd.f32 %v1029_v11, %v932_v58 }
 0x1b7   :  { %v1072_v22 = vadd.f32 %v2071_v53, %v1030_v1 }
 0x1b9   :  { %1088 = vxpose.xlu1.b32.cont [2/16] (narrow) %v1072_v22, 8 }
 0x1bc   :  { %v935_v20 = vpop.f32.mrf.mxu2  ;;  %v1032_v55 = vpop.f32.mrf.mxu3 }
 0x1bd   :  { %v1033_v56 = vadd.f32 %v1032_v55, %v935_v20 }
 0x1bf   :  { %v1073_v21 = vadd.f32 %v2071_v53, %v1033_v56 }
 0x1c1   :  { %1089 = vxpose.xlu1.b32.cont [3/16] (narrow) %v1073_v21, 8 }
 0x1c4   :  { %v937_v61 = vpop.f32.mrf.mxu2  ;;  %v1034_v32 = vpop.f32.mrf.mxu3 }
 0x1c5   :  { %v1035_v42 = vadd.f32 %v1034_v32, %v937_v61 }
 0x1c7   :  { %v1074_v54 = vadd.f32 %v2071_v53, %v1035_v42 }
 0x1c9   :  { %1090 = vxpose.xlu1.b32.cont [4/16] (narrow) %v1074_v54, 8 }
 0x1cc   :  { %v940_v63 = vpop.f32.mrf.mxu2  ;;  %v1037_v8 = vpop.f32.mrf.mxu3 }
 0x1cd   :  { %v1038_v24 = vadd.f32 %v1037_v8, %v940_v63 }
 0x1cf   :  { %v1075_v17 = vadd.f32 %v2071_v53, %v1038_v24 }
 0x1d1   :  { %1091 = vxpose.xlu1.b32.cont [5/16] (narrow) %v1075_v17, 8 }
 0x1d4   :  { %v942_v12 = vpop.f32.mrf.mxu2  ;;  %v1039_v18 = vpop.f32.mrf.mxu3 }
 0x1d5   :  { %v1040_v31 = vadd.f32 %v1039_v18, %v942_v12 }
 0x1d7   :  { %v1076_v23 = vadd.f32 %v2071_v53, %v1040_v31 }
 0x1d9   :  { %1092 = vxpose.xlu1.b32.cont [6/16] (narrow) %v1076_v23, 8 }
 0x1dc   :  { %v945_v29 = vpop.f32.mrf.mxu2  ;;  %v1042_v19 = vpop.f32.mrf.mxu3 }
 0x1dd   :  { %v1043_v13 = vadd.f32 %v1042_v19, %v945_v29 }
 0x1df   :  { %v1077_v46 = vadd.f32 %v2071_v53, %v1043_v13 }
 0x1e1   :  { %1093 = vxpose.xlu1.b32.cont [7/16] (narrow) %v1077_v46, 8 }
 0x1e4   :  { %v947_v47 = vpop.f32.mrf.mxu2  ;;  %v1044_v59 = vpop.f32.mrf.mxu3 }
 0x1e5   :  { %v1045_v40 = vadd.f32 %v1044_v59, %v947_v47 }
 0x1e7   :  { %v1078_v25 = vadd.f32 %v2071_v53, %v1045_v40 }
 0x1e9   :  { %1094 = vxpose.xlu1.b32.cont [8/16] (narrow) %v1078_v25, 8 }
 0x1ec   :  { %v950_v36 = vpop.f32.mrf.mxu2  ;;  %v1047_v7 = vpop.f32.mrf.mxu3 }
 0x1ed   :  { %v1048_v57 = vadd.f32 %v1047_v7, %v950_v36 }
 0x1ef   :  { %v1079_v45 = vadd.f32 %v2071_v53, %v1048_v57 }
 0x1f1   :  { %1095 = vxpose.xlu1.b32.cont [9/16] (narrow) %v1079_v45, 8 }
 0x1f4   :  { %v952_v16 = vpop.f32.mrf.mxu2  ;;  %v1049_v30 = vpop.f32.mrf.mxu3 }
 0x1f5   :  { %v1050_v28 = vadd.f32 %v1049_v30, %v952_v16 }
 0x1f7   :  { %v1080_v41 = vadd.f32 %v2071_v53, %v1050_v28 }
 0x1f9   :  { %1096 = vxpose.xlu1.b32.cont [10/16] (narrow) %v1080_v41, 8 }
 0x1fc   :  { %v955_v43 = vpop.f32.mrf.mxu2  ;;  %v1052_v49 = vpop.f32.mrf.mxu3 }
 0x1fd   :  { %v1053_v51 = vadd.f32 %v1052_v49, %v955_v43 }
 0x1ff   :  { %v1081_v27 = vadd.f32 %v2071_v53, %v1053_v51 }
 0x201   :  { %1097 = vxpose.xlu1.b32.cont [11/16] (narrow) %v1081_v27, 8 }
 0x204   :  { %v957_v52 = vpop.f32.mrf.mxu2  ;;  %v1054_v38 = vpop.f32.mrf.mxu3 }
 0x205   :  { %v1055_v34 = vadd.f32 %v1054_v38, %v957_v52 }
 0x207   :  { %v1082_v48 = vadd.f32 %v2071_v53, %v1055_v34 }
 0x209   :  { %1098 = vxpose.xlu1.b32.cont [12/16] (narrow) %v1082_v48, 8 }
 0x20c   :  { %v960_v14 = vpop.f32.mrf.mxu2  ;;  %v1057_v60 = vpop.f32.mrf.mxu3 }
 0x20d   :  { %v1058_v44 = vadd.f32 %v1057_v60, %v960_v14 }
 0x20f   :  { %v1083_v62 = vadd.f32 %v2071_v53, %v1058_v44 }
 0x211   :  { %1099 = vxpose.xlu1.b32.cont [13/16] (narrow) %v1083_v62, 8 }
 0x214   :  { %v962_v33 = vpop.f32.mrf.mxu2  ;;  %v1059_v39 = vpop.f32.mrf.mxu3 }
 0x215   :  { %v1060_v2 = vadd.f32 %v1059_v39, %v962_v33 }
 0x217   :  { %v1084_v3 = vadd.f32 %v2071_v53, %v1060_v2 }
 0x219   :  { %1100 = vxpose.xlu1.b32.cont [14/16] (narrow) %v1084_v3, 8 }
 0x21c   :  { %v965_v35 = vpop.f32.mrf.mxu2  ;;  %v1062_v0 = vpop.f32.mrf.mxu3 }
 0x21d   :  { %v1063_v15 = vadd.f32 %v1062_v0, %v965_v35 }
 0x21f   :  { %v1085_v4 = vadd.f32 %v2071_v53, %v1063_v15 }
 0x221   :  { %1101 = vxpose.xlu1.b32.cont [15/16] (narrow) %v1085_v4, 8 }
 0x224   :  { %v967_v5 = vpop.f32.mrf.mxu2  ;;  %v1064_v6 = vpop.f32.mrf.mxu3 }
 0x225   :  { %v1065_v9 = vadd.f32 %v1064_v6, %v967_v5 }
 0x227   :  { %v1086_v37 = vadd.f32 %v2071_v53, %v1065_v9 }
 0x229   :  { %1102 = vxpose.xlu1.b32.end [16/16] (narrow) %v1086_v37, 8 }
 0x255   :  { %v1103_v26 = vpop.trf.xlu1 }
 0x256   :  { %1119 = vst [vmem:[#allocation10] sm:$0x1] %v1103_v26 }
 0x257   :  { %1130 = dma.vmem_to_hbm [thread:$0]  %s1126_s21, 16, %s1128_s4, [#allocation4]  }
 0x258   :  { %1521 = dma.done.wait [#allocation4], 16  }
 0x259   :  { %1522 = vsyncadd [#allocation4], 4294967280 }
 0x25a   :  { %1135 = vsyncpa [#allocation3], 1 }
 0x25b   :  { %1136 = vsyncpa [#allocation6], 1 }
 0x25c   :  { %1137 = vsyncpa [#allocation9], 1 }
 0x25d   :  { %1138 = vsyncpa [#allocation4], 1 }

</bundles_post_ra>
